<compile_context>
chip_gen: v5e
topology: v5e:2x2
jax: 0.10.0
libtpu: 0.0.40
codegen_flags: <defaults>
</compile_context>

<pallas_src>
import jax
import jax.numpy as jnp
from jax.experimental import pallas as pl
from jax.experimental.pallas import tpu as pltpu

MU = 2.0


def _vanderpol_kernel(x_ref, o_ref):
    # x_ref: (TB, T, 2) VMEM tile of X; only the t = 0 slice feeds the dynamics.
    # o_ref: (TB, 2) output tile; lane 0 = xdt, lane 1 = ydt.
    s = x_ref[:, 0, :].astype(jnp.float32)            # (TB, 2): lane 0 = x, lane 1 = y
    x = s[:, 0:1]                                     # (TB, 1)
    y = s[:, 1:2]                                     # (TB, 1)
    xdt = MU * (x - (1.0 / 3.0) * (x * x * x) - y)    # (TB, 1)
    ydt = (1.0 / MU) * x                              # (TB, 1)
    out = jnp.concatenate((xdt, ydt), axis=1)         # (TB, 2), built once
    o_ref[...] = out.astype(o_ref.dtype)              # single store


def vanderpol_forward(X, U, *, block_b=512):
    """Pallas implementation of vanderpol.forward(X, U).

    X: (B, T, 2) state trajectory (only t = 0 is used, as in the reference).
    U: (B, T, 1) exogenous input — never read by the reference forward pass.
    Returns: (B, 2) = concat([xdt, ydt], axis=1).
    """
    del U  # U is never read by the reference forward pass.
    B, T, S = X.shape
    assert S == 2, f"expected state dim 2, got {S}"

    # Batch tile: full batch for small B (all block dims == array dims, always
    # legal), otherwise a multiple-of-8 tile so pipelining / megacore kick in.
    TB = B if B <= block_b else block_b
    grid = (pl.cdiv(B, TB),)

    return pl.pallas_call(
        _vanderpol_kernel,
        out_shape=jax.ShapeDtypeStruct((B, 2), X.dtype),
        grid=grid,
        in_specs=[
            # Fetch X directly; minor (T, 2) dims are full array dims (safe),
            # batch is tiled along the leading (unconstrained) dim.
            pl.BlockSpec((TB, T, 2), lambda i: (i, 0, 0)),
        ],
        out_specs=pl.BlockSpec((TB, 2), lambda i: (i, 0)),
        compiler_params=pltpu.CompilerParams(
            dimension_semantics=("parallel",),
        ),
    )(X)


def _reference(X, U):
    x = X[:, 0, 0:1].astype(jnp.float32)
    y = X[:, 0, 1:2].astype(jnp.float32)
    xdt = MU * (x - (1.0 / 3.0) * x ** 3 - y)
    ydt = (1.0 / MU) * x
    return jnp.concatenate((xdt, ydt), axis=1).astype(X.dtype)


if __name__ == "__main__":
    key = jax.random.PRNGKey(0)
    kx, ku, kx2, ku2 = jax.random.split(key, 4)

    # Small shapes consistent with the module: (B, T, 2) state, (B, T, 1) input.
    B, T = 4, 8
    X = jax.random.normal(kx, (B, T, 2), dtype=jnp.float32)
    U = jax.random.normal(ku, (B, T, 1), dtype=jnp.float32)

    out = jax.block_until_ready(vanderpol_forward(X, U))
    ref = jax.block_until_ready(_reference(X, U))
    assert out.shape == (B, 2), out.shape
    assert jnp.allclose(out, ref, atol=1e-5, rtol=1e-5), (out, ref)

    # Larger batch: exercises the real grid over B (3 blocks of 512) and the
    # "parallel" batch-axis semantics.
    B2 = 1536
    X2 = jax.random.normal(kx2, (B2, T, 2), dtype=jnp.float32)
    U2 = jax.random.normal(ku2, (B2, T, 1), dtype=jnp.float32)
    out2 = jax.block_until_ready(vanderpol_forward(X2, U2))
    ref2 = jax.block_until_ready(_reference(X2, U2))
    assert out2.shape == (B2, 2), out2.shape
    assert jnp.allclose(out2, ref2, atol=1e-5, rtol=1e-5)

    print("KERNEL_OK")
</pallas_src>

<mosaic_0001>
module attributes {stable_mosaic.version = 11 : i64} {
  func.func @_vanderpol_kernel(%arg0: i32, %arg1: memref<4x8x2xf32, #tpu.memory_space<vmem>>, %arg2: memref<4x2xf32, #tpu.memory_space<vmem>>) attributes {dimension_semantics = [#tpu.dimension_semantics<parallel>], iteration_bounds = array<i64: 1>, scalar_prefetch = 0 : i64, scratch_operands = 0 : i64, tpu.core_type = #tpu.core_type<tc>, window_params = [{transform_indices = @transform_0, window_bounds = array<i64: 4, 8, 2>}, {transform_indices = @transform_1, window_bounds = array<i64: 4, 2>}]} {
    %c0 = arith.constant 0 : index
    %c0_0 = arith.constant 0 : index
    %c0_1 = arith.constant 0 : index
    %0 = vector.load %arg1[%c0, %c0_0, %c0_1] : memref<4x8x2xf32, #tpu.memory_space<vmem>>, vector<4x1x2xf32>
    %1 = vector.shape_cast %0 : vector<4x1x2xf32> to vector<4x2xf32>
    %2 = vector.extract_strided_slice %1 {offsets = [0, 0], sizes = [4, 1], strides = [1, 1]} : vector<4x2xf32> to vector<4x1xf32>
    %3 = vector.extract_strided_slice %1 {offsets = [0, 1], sizes = [4, 1], strides = [1, 1]} : vector<4x2xf32> to vector<4x1xf32>
    %4 = arith.mulf %2, %2 : vector<4x1xf32>
    %5 = arith.mulf %4, %2 : vector<4x1xf32>
    %cst = arith.constant 0.333333343 : f32
    %6 = vector.broadcast %cst : f32 to vector<4x1xf32>
    %7 = arith.mulf %6, %5 : vector<4x1xf32>
    %8 = arith.subf %2, %7 : vector<4x1xf32>
    %9 = arith.subf %8, %3 : vector<4x1xf32>
    %cst_2 = arith.constant 2.000000e+00 : f32
    %10 = vector.broadcast %cst_2 : f32 to vector<4x1xf32>
    %11 = arith.mulf %10, %9 : vector<4x1xf32>
    %cst_3 = arith.constant 5.000000e-01 : f32
    %12 = vector.broadcast %cst_3 : f32 to vector<4x1xf32>
    %13 = arith.mulf %12, %2 : vector<4x1xf32>
    %14 = tpu.concatenate %11, %13 in 1 : vector<4x1xf32>, vector<4x1xf32> -> vector<4x2xf32>
    %c0_4 = arith.constant 0 : index
    %c0_5 = arith.constant 0 : index
    %15 = vector.load %arg2[%c0_4, %c0_5] : memref<4x2xf32, #tpu.memory_space<vmem>>, vector<4x2xf32>
    tpu.vector_store %arg2[%c0_4, %c0_5], %14 {strides = array<i32>} : memref<4x2xf32, #tpu.memory_space<vmem>>, vector<4x2xf32>,
    return
  }
  func.func @transform_0(%arg0: i32) -> (i32, i32, i32) {
    %c0_i32 = arith.constant 0 : i32
    %c0_i32_0 = arith.constant 0 : i32
    %c0_i32_1 = arith.constant 0 : i32
    return %arg0, %c0_i32, %c0_i32_0 : i32, i32, i32
  }
  func.func @transform_1(%arg0: i32) -> (i32, i32) {
    %c0_i32 = arith.constant 0 : i32
    %c0_i32_0 = arith.constant 0 : i32
    return %arg0, %c0_i32 : i32, i32
  }
}

</mosaic_0001>

<bundles_post_ra>
// kernel: tpu_custom_call.1
= control target key start
LH: loop header
LB: loop body
LE: loop exit
PB: predicated region body
PF: predicated region fallthrough
CT: control target
= control target key end

     0   :  { %s93_s12 = smov 127   ;;  %vm61_vm0 = vcmask 1041409   ;;  %vm64_vm1 = vcmask 1042434   ;;  %vm67_vm2 = vcmask 1043459   ;;  %s94_s15 = smov 1   ;;  %vm83_vm3 = vcmask 7168   ;;  %s126_s0 = inlined_call_operand.vmem [shape: f32[4,8,2], index: 0, kind: input, shape index: {}]   ;;  %s127_s1 = inlined_call_operand.vmem [shape: f32[4,2], index: 1, kind: output, shape index: {}]  }
   0x1   :  { %v9_v0 = vld [vmem:[%s126_s0 + $0x8] sm:$0x1]  ;;  %v8_v1 = vld [vmem:[%s126_s0] sm:$0x1]  ;;  %v10_v2 = vld [vmem:[%s126_s0 + $0x10] sm:$0x1] }
   0x2   :  { %34 = vrot.lane.b32.xlu0 %v9_v0, %s93_s12  ;;  %32 = vrot.lane.b32.xlu1 %v8_v1, %s93_s12  ;;  %v11_v3 = vld [vmem:[%s126_s0 + $0x18] sm:$0x1]  ;;  %v52_v4 = vmul.f32 0.5, %v8_v1  ;;  %v53_v5 = vmul.f32 0.5, %v9_v0  ;;  %v54_v6 = vmul.f32 0.5, %v10_v2  ;;  %v13_v14 = vmul.f32 %v9_v0, %v9_v0 }
   0x3   :  { %v55_v7 = vmul.f32 0.5, %v11_v3  ;;  %v12_v16 = vmul.f32 %v8_v1, %v8_v1  ;;  %v14_v17 = vmul.f32 %v10_v2, %v10_v2  ;;  %v15_v18 = vmul.f32 %v11_v3, %v11_v3 }
   0x4   :  { %v74_v8 = vrot.slane %v53_v5, 7  ;;  %v76_v9 = vrot.slane %v54_v6, 6  ;;  %v17_v15 = vmul.f32 %v13_v14, %v9_v0  ;;  %vm85_vm4 = vcmask 11264  }
   0x5   :  { %v78_v10 = vrot.slane %v55_v7, 5  ;;  %v16_v20 = vmul.f32 %v12_v16, %v8_v1  ;;  %v18_v21 = vmul.f32 %v14_v17, %v10_v2  ;;  %v19_v22 = vmul.f32 %v15_v18, %v11_v3 }
   0x6   :  { %v75_v11 = vsel %vm61_vm0, %v74_v8, %v52_v4  ;;  %v21_v19 = vmul.f32 0.33333334, %v17_v15 }
   0x7   :  { %v77_v12 = vsel %vm64_vm1, %v76_v9, %v75_v11  ;;  %v20_v24 = vmul.f32 0.33333334, %v16_v20  ;;  %v22_v27 = vmul.f32 0.33333334, %v18_v21  ;;  %v23_v28 = vmul.f32 0.33333334, %v19_v22 }
   0x8   :  { %v79_v13 = vsel %vm67_vm2, %v78_v10, %v77_v12  ;;  %v25_v23 = vsub.f32 %v9_v0, %v21_v19 }
   0x9   :  { %80 = vrot.lane.b32.xlu2 %v79_v13, %s94_s15  ;;  %v24_v30 = vsub.f32 %v8_v1, %v20_v24  ;;  %v26_v31 = vsub.f32 %v10_v2, %v22_v27  ;;  %v27_v32 = vsub.f32 %v11_v3, %v23_v28 }
   0xa   :  { %36 = vrot.lane.b32.xlu0 %v10_v2, %s93_s12  ;;  %38 = vrot.lane.b32.xlu1 %v11_v3, %s93_s12 }
  0x63   :  { %v81_v46 = vpop.permute.xlu2 %80 }
  0x74   :  { %v35_v25 = vpop.permute.xlu0 %34  ;;  %v33_v26 = vpop.permute.xlu1 %32 }
  0x75   :  { %v45_v29 = vsub.f32 %v25_v23, %v35_v25  ;;  %v44_v34 = vsub.f32 %v24_v30, %v33_v26 }
  0x77   :  { %v49_v33 = vmul.f32 2.0, %v45_v29  ;;  %v48_v40 = vmul.f32 2.0, %v44_v34 }
  0x79   :  { %v60_v39 = vrot.slane %v49_v33, 7 }
  0x7b   :  { %v62_v45 = vsel %vm61_vm0, %v60_v39, %v48_v40 }
  0x7c   :  { %v37_v35 = vpop.permute.xlu0 %36  ;;  %v39_v36 = vpop.permute.xlu1 %38 }
  0x7d   :  { %v46_v37 = vsub.f32 %v26_v31, %v37_v35  ;;  %v47_v38 = vsub.f32 %v27_v32, %v39_v36 }
  0x7f   :  { %v50_v41 = vmul.f32 2.0, %v46_v37  ;;  %v51_v42 = vmul.f32 2.0, %v47_v38 }
  0x81   :  { %v63_v43 = vrot.slane %v50_v41, 6  ;;  %v66_v44 = vrot.slane %v51_v42, 5 }
  0x83   :  { %v65_v47 = vsel %vm64_vm1, %v63_v43, %v62_v45 }
  0x84   :  { %v68_v48 = vsel %vm67_vm2, %v66_v44, %v65_v47 }
  0x85   :  { %v84_v49 = vsel %vm83_vm3, %v68_v48, %v81_v46 }
  0x86   :  { %86 = vst.msk [vmem:[%s127_s1] sm:$0xf] %vm85_vm4, %v84_v49 }

</bundles_post_ra>
